<compile_context>
chip_gen: v7x
topology: tpu7x:2x2x1
jax: 0.10.0
libtpu: 0.0.40
codegen_flags: <defaults>
</compile_context>

<pallas_src>
import math

import jax
import jax.numpy as jnp
from jax.experimental import pallas as pl
from jax.experimental.pallas import tpu as pltpu

EPS_FLOW = 1e-5          # the (1 - 1e-05) factor in get_flow_field / get_xt
STD_EPS = 1e-6           # data_std + 1e-06
NORM_EPS = 1e-12         # torch.nn.functional.normalize default eps

SMALL_C_MAX = 8          # <= this: unrolled VPU MACs for the 1x1 conv
VMEM_LIMIT = 48 << 20    # fits v7x (64 MiB physical) and v5e/v6e (128 MiB)
BLOCK_BYTES = 1 << 20    # ~1 MiB byte budget per x0/x1 input block


def _pick_tile(dim, unit, max_elems):
    """Largest multiple of `unit` dividing `dim` and <= max_elems.
    Falls back to the full `dim` when it is not unit-divisible (full-extent
    blocks are always legal)."""
    if dim <= unit or dim % unit != 0:
        return dim
    best = unit
    t = unit
    limit = min(dim, max(unit, max_elems))
    while t <= limit:
        if dim % t == 0:
            best = t
        t += unit
    return best


# ---------------------------------------------------------------------------
# Kernel 1: unbiased std of x1 -> rescale factor (flat 2D view, vector accs).
# ---------------------------------------------------------------------------
def make_scale_call(rows, cols, target_std, dtype):
    itemsize = jnp.dtype(dtype).itemsize
    lane_tile = _pick_tile(cols, 128, max(128, (BLOCK_BYTES // 8) // itemsize))
    row_budget = max(8, BLOCK_BYTES // max(1, lane_tile * itemsize))
    row_tile = _pick_tile(rows, 8, row_budget)
    n_row = rows // row_tile
    n_lane = cols // lane_tile
    n_total = float(rows * cols)

    def kernel(x_ref, scale_ref, acc_s, acc_q):
        r = pl.program_id(0)
        l = pl.program_id(1)

        @pl.when(jnp.logical_and(r == 0, l == 0))
        def _init():
            acc_s[...] = jnp.zeros_like(acc_s)
            acc_q[...] = jnp.zeros_like(acc_q)

        x = x_ref[...].astype(jnp.float32)        # per-tile upcast in VMEM
        acc_s[...] = acc_s[...] + x               # pure VPU adds, no reduce
        acc_q[...] = acc_q[...] + x * x

        @pl.when(jnp.logical_and(r == pl.num_programs(0) - 1,
                                 l == pl.num_programs(1) - 1))
        def _fin():                               # single reduce in epilogue
            total = jnp.sum(acc_s[...])
            sq = jnp.sum(acc_q[...])
            mean = total / n_total
            var = (sq - n_total * mean * mean) / (n_total - 1.0)
            std = jnp.sqrt(jnp.maximum(var, 0.0))
            scale_ref[0, 0] = jnp.float32(target_std) / (std + STD_EPS)

    grid_spec = pltpu.PrefetchScalarGridSpec(
        num_scalar_prefetch=0,
        grid=(n_row, n_lane),
        in_specs=[pl.BlockSpec((row_tile, lane_tile), lambda r, l: (r, l))],
        out_specs=pl.BlockSpec((1, 1), lambda r, l: (0, 0),
                               memory_space=pltpu.SMEM),
        scratch_shapes=[pltpu.VMEM((row_tile, lane_tile), jnp.float32),
                        pltpu.VMEM((row_tile, lane_tile), jnp.float32)],
    )
    return pl.pallas_call(
        kernel,
        out_shape=jax.ShapeDtypeStruct((1, 1), jnp.float32),
        grid_spec=grid_spec,
        compiler_params=pltpu.CompilerParams(
            dimension_semantics=("arbitrary", "arbitrary"),
            vmem_limit_bytes=VMEM_LIMIT),
    )


# ---------------------------------------------------------------------------
# Kernel 2: fused flow targets + 1x1-conv stand-in + loss partial sums.
# Outputs per-batch-row element-wise partial sums (accumulated in resident
# output blocks); the tiny final reduce / cosine combine happens in XLA.
# ---------------------------------------------------------------------------
def make_fused_call(B, C, HW, dtype, apply_scale, with_direction):
    itemsize = jnp.dtype(dtype).itemsize
    lane_tile = _pick_tile(HW, 128, max(128, BLOCK_BYTES // max(1, C * itemsize)))
    n_lane = HW // lane_tile
    small = C <= SMALL_C_MAX
    acc_rows = 1 if small else C
    n_out = 3 if with_direction else 1

    def kernel(*refs):
        idx = 0
        if apply_scale:
            scale_ref = refs[idx]
            idx += 1
        t_ref = refs[idx]
        x0_ref = refs[idx + 1]
        x1_ref = refs[idx + 2]
        w_ref = refs[idx + 3]
        b_ref = refs[idx + 4]
        out_refs = refs[idx + 5: idx + 5 + n_out]

        b = pl.program_id(0)
        l = pl.program_id(1)

        t = t_ref[b]                              # scalar from SMEM, per row
        x0 = x0_ref[0].astype(jnp.float32)        # (C, lane_tile)
        x1 = x1_ref[0].astype(jnp.float32)
        if apply_scale:
            x1 = x1 * scale_ref[0, 0]
        tgt = x1 - (1.0 - EPS_FLOW) * x0          # get_flow_field
        xt = x0 + t * tgt                         # get_xt

        if small:
            # 1x1 conv via unrolled scalar-vector MACs (VPU); never
            # materializes the full (C, L) prediction tensor.
            parts = None
            for cc in range(C):
                pr = xt[0:1, :] * w_ref[cc, 0]
                for k in range(1, C):
                    pr = pr + xt[k:k + 1, :] * w_ref[cc, k]
                pr = pr + b_ref[cc]
                tg = tgt[cc:cc + 1, :]
                if with_direction:
                    new = (pr * tg, pr * pr, tg * tg)
                else:
                    d = pr - tg
                    new = (d * d,)
                parts = new if parts is None else tuple(
                    a + p for a, p in zip(parts, new))
            partials = parts
        else:
            wt = w_ref[...]
            xm = xt
            if C >= 128:                          # MXU-friendly bf16 inputs
                wt = wt.astype(jnp.bfloat16)
                xm = xm.astype(jnp.bfloat16)
            pred = jnp.dot(wt, xm, preferred_element_type=jnp.float32) + b_ref[...]
            if with_direction:
                partials = (pred * tgt, pred * pred, tgt * tgt)
            else:
                d = pred - tgt
                partials = (d * d,)

        # Accumulate element-wise into resident per-row output blocks.
        @pl.when(l == 0)
        def _init():
            for o, p in zip(out_refs, partials):
                o[0] = p

        @pl.when(l > 0)
        def _acc():
            for o, p in zip(out_refs, partials):
                o[0] = o[0] + p

    in_specs = []
    if apply_scale:
        in_specs.append(pl.BlockSpec((1, 1), lambda b, l: (0, 0),
                                     memory_space=pltpu.SMEM))
    in_specs.append(pl.BlockSpec((B,), lambda b, l: (0,),
                                 memory_space=pltpu.SMEM))
    in_specs.append(pl.BlockSpec((1, C, lane_tile), lambda b, l: (b, 0, l)))
    in_specs.append(pl.BlockSpec((1, C, lane_tile), lambda b, l: (b, 0, l)))
    if small:
        in_specs.append(pl.BlockSpec((C, C), lambda b, l: (0, 0),
                                     memory_space=pltpu.SMEM))
        in_specs.append(pl.BlockSpec((C,), lambda b, l: (0,),
                                     memory_space=pltpu.SMEM))
    else:
        in_specs.append(pl.BlockSpec((C, C), lambda b, l: (0, 0)))
        in_specs.append(pl.BlockSpec((C, 1), lambda b, l: (0, 0)))

    out_block = pl.BlockSpec((1, acc_rows, lane_tile), lambda b, l: (b, 0, 0))
    out_shape_one = jax.ShapeDtypeStruct((B, acc_rows, lane_tile), jnp.float32)
    if with_direction:
        out_specs = (out_block, out_block, out_block)
        out_shape = (out_shape_one, out_shape_one, out_shape_one)
    else:
        out_specs = out_block
        out_shape = out_shape_one

    grid_spec = pltpu.PrefetchScalarGridSpec(
        num_scalar_prefetch=0,
        grid=(B, n_lane),
        in_specs=in_specs,
        out_specs=out_specs,
        scratch_shapes=[],
    )
    return pl.pallas_call(
        kernel,
        out_shape=out_shape,
        grid_spec=grid_spec,
        compiler_params=pltpu.CompilerParams(
            dimension_semantics=("parallel", "arbitrary"),
            vmem_limit_bytes=VMEM_LIMIT),
    )


# ---------------------------------------------------------------------------
# Shortcut (flow matching) module, Pallas version
# ---------------------------------------------------------------------------
class ShortcutPallas:
    def __init__(self, channels, n_T, drop_prob=0.1,
                 add_velocity_direction_loss=True, target_std=0.5,
                 model_key=jax.random.PRNGKey(42)):
        self.n_T = n_T
        self.drop_prob = drop_prob
        self.add_velocity_direction_loss = add_velocity_direction_loss
        self.target_std = target_std
        # flow_matching_schedules buffer
        self.t_schedule = jnp.linspace(0.0, 1.0, n_T + 1)
        # deterministic stand-in "model": 1x1 conv over channels
        kw, kb = jax.random.split(model_key)
        self.w = (jax.random.normal(kw, (channels, channels), jnp.float32)
                  / math.sqrt(channels))
        self.bias = 0.1 * jax.random.normal(kb, (channels, 1), jnp.float32)

    def forward(self, x0, x1, c, key):
        B, C, H, W = x0.shape
        HW = H * W
        # NCHW flattens contiguously to (B, C, H*W): spatial sits on the lane
        # axis, no transposes.  Native dtype is kept (upcast per tile in VMEM).
        x0r = x0.reshape(B, C, HW)
        x1r = x1.reshape(B, C, HW)

        apply_scale = (self.target_std != 1.0)
        args = []
        if apply_scale:
            scale = make_scale_call(B * C, HW, self.target_std,
                                    x1.dtype)(x1.reshape(B * C, HW))
            args.append(scale)

        # --- sample t like the module: randint(0, n_T)/n_T per batch elem ---
        kt, _ = jax.random.split(key)
        t = jax.random.randint(kt, (B, 1), 0, self.n_T).astype(jnp.float32)
        t = t / self.n_T

        # TODO(synk): the bernoulli context_mask and (c, dt) conditioning feed
        # the external model only; the deterministic stand-in ignores them.

        small = C <= SMALL_C_MAX
        b_arg = self.bias.reshape(C) if small else self.bias
        args += [t.reshape(B), x0r, x1r, self.w, b_arg]

        fused = make_fused_call(B, C, HW, x0r.dtype, apply_scale,
                                self.add_velocity_direction_loss)
        outs = fused(*args)

        n_total = float(B * C * HW)
        if self.add_velocity_direction_loss:
            pt, pp, tt = outs
            pt_b = jnp.sum(pt, axis=(1, 2))      # per-row Σ pred*tgt
            pp_b = jnp.sum(pp, axis=(1, 2))      # per-row Σ pred*pred
            tt_b = jnp.sum(tt, axis=(1, 2))      # per-row Σ tgt*tgt
            sse = jnp.sum(pp_b) - 2.0 * jnp.sum(pt_b) + jnp.sum(tt_b)
            mse = sse / n_total
            cos = pt_b / (jnp.maximum(jnp.sqrt(pp_b), NORM_EPS)
                          * jnp.maximum(jnp.sqrt(tt_b), NORM_EPS))
            loss = mse + (1.0 - jnp.mean(cos))
        else:
            sse_parts = outs
            loss = jnp.sum(sse_parts) / n_total
        return loss, t


# ---------------------------------------------------------------------------
# Pure-JAX reference for verification
# ---------------------------------------------------------------------------
def reference_forward(module, x0, x1, t):
    B, C, H, W = x0.shape
    x0f = x0.reshape(B, C, H * W).astype(jnp.float32)
    x1f = x1.reshape(B, C, H * W).astype(jnp.float32)
    if module.target_std != 1.0:
        std = jnp.std(x1f, ddof=1)
        x1f = x1f * (module.target_std / (std + STD_EPS))
    tgt = x1f - (1.0 - EPS_FLOW) * x0f
    x_t = x0f + t[:, :, None] * tgt
    pred = jnp.einsum('ck,bkl->bcl', module.w, x_t) + module.bias[None, :, :]
    mse = jnp.mean((pred - tgt) ** 2)
    pf = pred.reshape(B, -1)
    tf = tgt.reshape(B, -1)
    pn = pf / jnp.maximum(jnp.linalg.norm(pf, axis=1, keepdims=True), NORM_EPS)
    tn = tf / jnp.maximum(jnp.linalg.norm(tf, axis=1, keepdims=True), NORM_EPS)
    cos = jnp.sum(pn * tn, axis=1)
    loss = mse
    if module.add_velocity_direction_loss:
        loss = loss + (1.0 - jnp.mean(cos))
    return loss


if __name__ == "__main__":
    B, C, H, W = 2, 4, 16, 16
    n_T = 16

    key = jax.random.PRNGKey(0)
    k0, k1, kc, kfwd = jax.random.split(key, 4)
    x0 = jax.random.normal(k0, (B, C, H, W), jnp.float32)   # noise
    x1 = jax.random.normal(k1, (B, C, H, W), jnp.float32)   # data
    c = jax.random.normal(kc, (B, 8), jnp.float32)          # conditioning

    module = ShortcutPallas(channels=C, n_T=n_T, drop_prob=0.1,
                            add_velocity_direction_loss=True, target_std=0.5)

    loss, t_used = module.forward(x0, x1, c, kfwd)
    loss = jax.block_until_ready(loss)

    ref = reference_forward(module, x0, x1, t_used)
    assert jnp.allclose(loss, ref, rtol=3e-4, atol=3e-5), (loss, ref)

    print("KERNEL_OK")
</pallas_src>

<mosaic_0001>
module attributes {stable_mosaic.version = 11 : i64} {
  func.func @kernel(%arg0: i32, %arg1: i32, %arg2: memref<8x256xf32, #tpu.memory_space<vmem>>, %arg3: memref<1x1xf32, #tpu.memory_space<smem>>, %arg4: memref<8x256xf32, #tpu.memory_space<vmem>>, %arg5: memref<8x256xf32, #tpu.memory_space<vmem>>) attributes {dimension_semantics = [#tpu.dimension_semantics<arbitrary>, #tpu.dimension_semantics<arbitrary>], iteration_bounds = array<i64: 1, 1>, scalar_prefetch = 0 : i64, scratch_operands = 2 : i64, tpu.core_type = #tpu.core_type<tc>, window_params = [{transform_indices = @transform_0, window_bounds = array<i64: 8, 256>}, {transform_indices = @transform_1, window_bounds = array<i64: 1, 1>}]} {
    %c0_i32 = arith.constant 0 : i32
    %0 = arith.cmpi eq, %arg0, %c0_i32 : i32
    %c0_i32_0 = arith.constant 0 : i32
    %1 = arith.cmpi eq, %arg1, %c0_i32_0 : i32
    %2 = arith.andi %0, %1 : i1
    %3 = arith.extui %2 : i1 to i32
    %c0_i32_1 = arith.constant 0 : i32
    %4 = arith.cmpi ne, %3, %c0_i32_1 : i32
    scf.if %4 {
      %cst = arith.constant 0.000000e+00 : f32
      %18 = vector.broadcast %cst : f32 to vector<8x256xf32>
      %c0_14 = arith.constant 0 : index
      %c0_15 = arith.constant 0 : index
      %19 = vector.load %arg4[%c0_14, %c0_15] : memref<8x256xf32, #tpu.memory_space<vmem>>, vector<8x256xf32>
      tpu.vector_store %arg4[%c0_14, %c0_15], %18 {strides = array<i32>} : memref<8x256xf32, #tpu.memory_space<vmem>>, vector<8x256xf32>,
      %cst_16 = arith.constant 0.000000e+00 : f32
      %20 = vector.broadcast %cst_16 : f32 to vector<8x256xf32>
      %c0_17 = arith.constant 0 : index
      %c0_18 = arith.constant 0 : index
      %21 = vector.load %arg5[%c0_17, %c0_18] : memref<8x256xf32, #tpu.memory_space<vmem>>, vector<8x256xf32>
      tpu.vector_store %arg5[%c0_17, %c0_18], %20 {strides = array<i32>} : memref<8x256xf32, #tpu.memory_space<vmem>>, vector<8x256xf32>,
    } else {
    }
    %c0 = arith.constant 0 : index
    %c0_2 = arith.constant 0 : index
    %5 = vector.load %arg2[%c0, %c0_2] : memref<8x256xf32, #tpu.memory_space<vmem>>, vector<8x256xf32>
    %c0_3 = arith.constant 0 : index
    %c0_4 = arith.constant 0 : index
    %6 = vector.load %arg4[%c0_3, %c0_4] : memref<8x256xf32, #tpu.memory_space<vmem>>, vector<8x256xf32>
    %7 = arith.addf %6, %5 : vector<8x256xf32>
    %c0_5 = arith.constant 0 : index
    %c0_6 = arith.constant 0 : index
    %8 = vector.load %arg4[%c0_5, %c0_6] : memref<8x256xf32, #tpu.memory_space<vmem>>, vector<8x256xf32>
    tpu.vector_store %arg4[%c0_5, %c0_6], %7 {strides = array<i32>} : memref<8x256xf32, #tpu.memory_space<vmem>>, vector<8x256xf32>,
    %c0_7 = arith.constant 0 : index
    %c0_8 = arith.constant 0 : index
    %9 = vector.load %arg5[%c0_7, %c0_8] : memref<8x256xf32, #tpu.memory_space<vmem>>, vector<8x256xf32>
    %10 = arith.mulf %5, %5 : vector<8x256xf32>
    %11 = arith.addf %9, %10 : vector<8x256xf32>
    %c0_9 = arith.constant 0 : index
    %c0_10 = arith.constant 0 : index
    %12 = vector.load %arg5[%c0_9, %c0_10] : memref<8x256xf32, #tpu.memory_space<vmem>>, vector<8x256xf32>
    tpu.vector_store %arg5[%c0_9, %c0_10], %11 {strides = array<i32>} : memref<8x256xf32, #tpu.memory_space<vmem>>, vector<8x256xf32>,
    %c0_i32_11 = arith.constant 0 : i32
    %13 = arith.cmpi eq, %arg0, %c0_i32_11 : i32
    %c0_i32_12 = arith.constant 0 : i32
    %14 = arith.cmpi eq, %arg1, %c0_i32_12 : i32
    %15 = arith.andi %13, %14 : i1
    %16 = arith.extui %15 : i1 to i32
    %c0_i32_13 = arith.constant 0 : i32
    %17 = arith.cmpi ne, %16, %c0_i32_13 : i32
    scf.if %17 {
      %c0_14 = arith.constant 0 : index
      %c0_15 = arith.constant 0 : index
      %18 = vector.load %arg4[%c0_14, %c0_15] : memref<8x256xf32, #tpu.memory_space<vmem>>, vector<8x256xf32>
      %19 = vector.shape_cast %18 : vector<8x256xf32> to vector<1x8x256xf32>
      %cst = arith.constant dense<0.000000e+00> : vector<1xf32>
      %20 = vector.multi_reduction <add>, %19, %cst [1, 2] : vector<1x8x256xf32> to vector<1xf32>
      %21 = vector.shape_cast %20 : vector<1xf32> to vector<1x1x1xf32>
      %22 = vector.extract %21[0, 0, 0] : f32 from vector<1x1x1xf32>
      %c0_16 = arith.constant 0 : index
      %c0_17 = arith.constant 0 : index
      %23 = vector.load %arg5[%c0_16, %c0_17] : memref<8x256xf32, #tpu.memory_space<vmem>>, vector<8x256xf32>
      %24 = vector.shape_cast %23 : vector<8x256xf32> to vector<1x8x256xf32>
      %cst_18 = arith.constant dense<0.000000e+00> : vector<1xf32>
      %25 = vector.multi_reduction <add>, %24, %cst_18 [1, 2] : vector<1x8x256xf32> to vector<1xf32>
      %26 = vector.shape_cast %25 : vector<1xf32> to vector<1x1x1xf32>
      %27 = vector.extract %26[0, 0, 0] : f32 from vector<1x1x1xf32>
      %cst_19 = arith.constant 2.048000e+03 : f32
      %28 = arith.divf %22, %cst_19 : f32
      %cst_20 = arith.constant 2.048000e+03 : f32
      %29 = arith.mulf %cst_20, %28 : f32
      %30 = arith.mulf %29, %28 : f32
      %31 = arith.subf %27, %30 : f32
      %cst_21 = arith.constant 2.047000e+03 : f32
      %32 = arith.divf %31, %cst_21 : f32
      %cst_22 = arith.constant 0.000000e+00 : f32
      %33 = arith.maximumf %32, %cst_22 : f32
      %34 = math.sqrt %33 : f32
      %cst_23 = arith.constant 9.99999997E-7 : f32
      %35 = arith.addf %34, %cst_23 : f32
      %cst_24 = arith.constant 5.000000e-01 : f32
      %36 = arith.divf %cst_24, %35 : f32
      %c0_25 = arith.constant 0 : index
      %c0_26 = arith.constant 0 : index
      %37 = memref.load %arg3[%c0_25, %c0_26] : memref<1x1xf32, #tpu.memory_space<smem>>
      memref.store %36, %arg3[%c0_25, %c0_26] : memref<1x1xf32, #tpu.memory_space<smem>>
    } else {
    }
    return
  }
  func.func @transform_0(%arg0: i32, %arg1: i32) -> (i32, i32) {
    %c0_i32 = arith.constant 0 : i32
    return %arg0, %arg1 : i32, i32
  }
  func.func @transform_1(%arg0: i32, %arg1: i32) -> (i32, i32) {
    %c0_i32 = arith.constant 0 : i32
    %c0_i32_0 = arith.constant 0 : i32
    %c0_i32_1 = arith.constant 0 : i32
    return %c0_i32, %c0_i32_0 : i32, i32
  }
}

</mosaic_0001>

<bundles_post_ra>
// kernel: tpu_custom_call.1
= control target key start
LH: loop header
LB: loop body
LE: loop exit
PB: predicated region body
PF: predicated region fallthrough
CT: control target
= control target key end

     0   :  { %6 = vsyncpa [#allocation5], 0  ;;  %s201_s0 = inlined_call_operand.hbm [shape: f32[8,256], index: 0, kind: input, shape index: {}]   ;;  %s202_s1 = inlined_call_operand.hbm [shape: f32[1,1], index: 1, kind: output, shape index: {}]  }
   0x1   :  { %7 = vsyncpa [#allocation6], 0  ;;  %s164_s6 = smov [#allocation4]   ;;  %s128_s10 = scalar_lea.hbm %s201_s0, 256 }
   0x2   :  { %s14_s7 = sshll.u32 %s164_s6, 4  ;;  %p129_p0 = scmp.ne.s32.totalorder %s201_s0, %s128_s10  ;;  %s15_s7 = int_to_ptr.vmem [resolvable:$true] %s14_s7 }
   0x3   :  { %p132_p1 = scmp.lt.u32.totalorder %s128_s10, %s201_s0 }
   0x5   :  { %p134_p2 = pnand %p132_p1, %p129_p0 }
   0x7   :  { %137 = shalt.err (!%p134_p2)
}
   0x8   :  { %s138_s15 = scalar_lea.vmem %s15_s7, 256  ;;  %p143_p4 = scmp.lt.s32.totalorder %s15_s7, %s15_s7 }
   0x9   :  { %p139_p3 = scmp.ne.s32.totalorder %s15_s7, %s138_s15  ;;  %p144_p5 = scmp.lt.s32.totalorder %s138_s15, %s138_s15 }
   0xb   :  { %p145_p6 = por %p144_p5, %p143_p4 }
   0xd   :  { %p146_p7 = pnand %p145_p6, %p139_p3 }
   0xf   :  { %149 = shalt.err (!%p146_p7)
}
  0x10   :  { %17 = dma.hbm_to_vmem [thread:$0]  %s201_s0, 256, %s15_s7, [#allocation5]  }
  0x11   :  { %160 = dma.done.wait [#allocation5], 256  }
  0x12   :  { %161 = vsyncadd [#allocation5], 4294967040  ;;  %v31_v0 = vld [vmem:[#allocation4] sm:$0xff]  ;;  %v32_v1 = vld [vmem:[#allocation4 + $0x8] sm:$0xff]  ;;  %s165_s24 = smov 0.0   ;;  %s150_s3 = scalar_lea.hbm %s202_s1, 16 }
  0x13   :  { %v42_v2 = vmul.f32 %v32_v1, %v32_v1  ;;  %v51_v3 = vadd.f32 %v32_v1, %v31_v0  ;;  %v41_v4 = vmul.f32 %v31_v0, %v31_v0  ;;  %p151_p8 = scmp.ne.s32.totalorder %s202_s1, %s150_s3  ;;  %p154_p9 = scmp.lt.u32.totalorder %s150_s3, %s202_s1 }
  0x15   :  { %52 = vadd.xlane.f32.xlu0 %v51_v3  ;;  %v63_v5 = vadd.f32 %v42_v2, %v41_v4  ;;  %p156_p10 = pnand %p154_p9, %p151_p8 }
  0x19   :  { %64 = vadd.xlane.f32.xlu0 %v63_v5 }
  0xa2   :  { %v53_v6 = vpop.xlane.xlu0 %52 }
  0xa3   :  { %v54_v7 = vrot.slane %v53_v6, 4 }
  0xa5   :  { %v55_v8 = vadd.f32 %v54_v7, %v53_v6 }
  0xa6   :  { %v65_v9 = vpop.xlane.xlu0 %64 }
  0xa7   :  { %v56_v10 = vrot.slane %v55_v8, 2  ;;  %v66_v11 = vrot.slane %v65_v9, 4 }
  0xa9   :  { %v67_v12 = vadd.f32 %v66_v11, %v65_v9  ;;  %v57_v13 = vadd.f32 %v56_v10, %v55_v8 }
  0xab   :  { %v68_v14 = vrot.slane %v67_v12, 2  ;;  %v58_v15 = vrot.slane %v57_v13, 1 }
  0xad   :  { %v69_v16 = vadd.f32 %v68_v14, %v67_v12  ;;  %v59_v17 = vadd.f32 %v58_v15, %v57_v13 }
  0xaf   :  { %113 = vpush %v59_v17  ;;  %v70_v18 = vrot.slane %v69_v16, 1 }
  0xb1   :  { %v71_v19 = vadd.f32 %v70_v18, %v69_v16 }
  0xb3   :  { %115 = vpush %v71_v19 }
  0xe0   :  { %s114_s0 = spop %113 }
  0xe1   :  { %s75_s18 = smul.f32 0.00048828125, %s114_s0 }
  0xe3   :  { %s76_s19 = smul.f32 2048.0, %s75_s18 }
  0xe4   :  { %s116_s21 = spop %115 }
  0xe5   :  { %s77_s20 = smul.f32 %s76_s19, %s75_s18 }
  0xe7   :  { %s78_s22 = ssub.f32 %s116_s21, %s77_s20 }
  0xe9   :  { %s81_s23 = smul.f32 0.0004885198, %s78_s22 }
  0xeb   :  { %s82_s25 = smax.f32 %s165_s24, %s81_s23 }
  0xec   :  { %v83_v20 = vstv %s82_s25 }
  0xed   :  { %124 = vrsqrt.f32 %v83_v20  ;;  %vm86_vm0 = vcmp.eq.f32.partialorder %v83_v20, inf  ;;  %v89_v23 = vand.u32 2147483648, %v83_v20  ;;  %vm88_vm1 = vcmp.eq.f32.partialorder %v83_v20, 0.0 }
  0xf7   :  { %v125_v21 = vpop.eup %124 }
  0xf8   :  { %v85_v22 = vmul.f32 %v125_v21, %v83_v20 }
  0xfa   :  { %v87_v24 = vsel %vm86_vm0, %v83_v20, %v85_v22 }
  0xfb   :  { %v90_v25 = vsel %vm88_vm1, %v89_v23, %v87_v24 }
  0xfc   :  { %117 = vpush %v90_v25 }
 0x12d   :  { %s118_s26 = spop %117 }
 0x12e   :  { %s92_s27 = sadd.f32 1e-06, %s118_s26 }
 0x130   :  { %v93_v26 = vstv %s92_s27 }
 0x131   :  { %126 = vrcp.f32 %v93_v26 }
 0x13b   :  { %v127_v27 = vpop.eup %126 }
 0x13c   :  { %119 = vpush %v127_v27 }
 0x16d   :  { %s120_s28 = spop %119 }
 0x16e   :  { %s96_s29 = smul.f32 0.5, %s120_s28 }
 0x170   :  { %98 = sst [smem:[#allocation7]] %s96_s29 }
 0x171   :  { %159 = shalt.err (!%p156_p10)
}
 0x172   :  { %s166_s8 = smov [#allocation7]  }
 0x173   :  { %106 = dma.smem_to_hbm %s166_s8, 16, %s202_s1, [#allocation6]  }
 0x174   :  { %162 = dma.done.wait [#allocation6], 16  }
 0x175   :  { %163 = vsyncadd [#allocation6], 4294967280 }
 0x176   :  { %110 = sfence }
 0x177   :  { %111 = vsyncpa [#allocation5], 1 }
 0x178   :  { %112 = vsyncpa [#allocation6], 1 }

</bundles_post_ra>
